<compile_context>
chip_gen: v6e
topology: v6e:2x2x1
jax: 0.10.0
libtpu: 0.0.40
codegen_flags: <defaults>
</compile_context>

<pallas_src>
import functools
import math

import jax
import jax.numpy as jnp
from jax.experimental import pallas as pl
from jax.experimental.pallas import tpu as pltpu


# ---------------------------------------------------------------------------
# Helpers
# ---------------------------------------------------------------------------
_SUPPORTED = ("relu", "prelu", "hardswish", "silu", "gelu")
_FALLBACK_ELEMS = 1 << 16          # tiny tensors: plain XLA fusion wins
_BLOCK_BYTES = 2 * 1024 * 1024     # ~2 MiB per block (x4 when double-buffered)
_VMEM_LIMIT = 32 * 1024 * 1024     # explicit scoped-VMEM budget (safe on v5e/v6e/v7x)


def _round_up(a, b):
    return -(-a // b) * b


def _sublane(dtype):
    """Native sublane packing: 8 rows for 4-byte, 16 for bf16, 32 for int8/fp8."""
    return max(8, 32 // jnp.dtype(dtype).itemsize)


def _dim_semantics(n_axes):
    """Leading axis CORE_PARALLEL on v7x (2 TCs/chip), plain parallel elsewhere."""
    lead = pltpu.PARALLEL
    try:
        if "v7" in jax.devices()[0].device_kind.lower():
            lead = pltpu.CORE_PARALLEL
    except Exception:
        pass
    return (lead,) + (pltpu.PARALLEL,) * (n_axes - 1)


# ---------------------------------------------------------------------------
# Kernels
# ---------------------------------------------------------------------------
def _act_kernel(x_ref, o_ref, *, act_type, approximate_gelu):
    x = x_ref[...]
    if act_type == "relu":
        y = jnp.maximum(x, 0.0)
    elif act_type == "hardswish":
        # x * relu6(x + 3) / 6   (PyTorch nn.Hardswish), native dtype
        y = x * jnp.clip(x + 3.0, 0.0, 6.0) * (1.0 / 6.0)
    elif act_type == "silu":
        xf = x.astype(jnp.float32)
        z = jnp.exp(-jnp.abs(xf))                       # EUP
        y = xf * jnp.where(xf >= 0.0, 1.0, z) / (1.0 + z)
    elif act_type == "gelu":
        xf = x.astype(jnp.float32)
        if approximate_gelu:
            # tanh approximation -> EUP (opt-in; deviates slightly from nn.GELU()).
            c = math.sqrt(2.0 / math.pi)
            y = 0.5 * xf * (1.0 + jnp.tanh(c * (xf + 0.044715 * xf * xf * xf)))
        else:
            # nn.GELU() default = exact erf formulation
            y = 0.5 * xf * (1.0 + jax.lax.erf(xf * (1.0 / math.sqrt(2.0))))
    else:
        y = x
    o_ref[...] = y.astype(o_ref.dtype)


def _prelu_kernel(alpha_ref, x_ref, o_ref):
    x = x_ref[...]
    a = alpha_ref[...].astype(x.dtype)          # (TM, 1) -> broadcast over lanes
    o_ref[...] = jnp.where(x >= 0.0, x, a * x).astype(o_ref.dtype)


# ---------------------------------------------------------------------------
# Pallas paths
# ---------------------------------------------------------------------------
def _elementwise_pallas(x, act_type, *, approximate_gelu, inplace, block_bytes):
    """relu/hardswish/silu/gelu: flatten to a lane-dense (rows, lanes) bitcast view."""
    orig_shape = x.shape
    total = x.size

    lanes = None
    for cand in (2048, 1024, 512, 256, 128):
        if total % cand == 0:
            lanes = cand
            break
    if lanes is None:
        # Total not a multiple of 128 (rare for conv feature maps).  Padding in
        # the wrapper would cost an extra full HBM pass, so let XLA handle it.
        return _jax_act(x, act_type).astype(x.dtype)

    rows = total // lanes
    sub = _sublane(x.dtype)
    itemsize = jnp.dtype(x.dtype).itemsize
    if rows <= sub:
        tm = rows                                   # block dim == full dim (legal)
    else:
        target_rows = max(1, (block_bytes // itemsize) // lanes)
        tm = min((rows // sub) * sub, _round_up(target_rows, sub))
    grid_m = pl.cdiv(rows, tm)                      # ragged last block is masked

    x2 = x.reshape(rows, lanes)                     # contiguous view, no HBM pass
    kernel = functools.partial(_act_kernel, act_type=act_type,
                               approximate_gelu=approximate_gelu)
    out2 = pl.pallas_call(
        kernel,
        out_shape=jax.ShapeDtypeStruct((rows, lanes), x.dtype),
        grid=(grid_m,),
        in_specs=[pl.BlockSpec((tm, lanes), lambda i: (i, 0))],
        out_specs=pl.BlockSpec((tm, lanes), lambda i: (i, 0)),
        input_output_aliases=({0: 0} if inplace else {}),
        compiler_params=pltpu.CompilerParams(
            dimension_semantics=_dim_semantics(1),
            vmem_limit_bytes=_VMEM_LIMIT),
    )(x2)
    return out2.reshape(orig_shape)


def _prelu_pallas(x, prelu_weight, *, inplace, block_bytes):
    """PReLU: (N*C, H*W) view so alpha is a per-row scalar; no HBM padding."""
    N, C, H, W = x.shape
    rows, cols = N * C, H * W
    sub = _sublane(x.dtype)
    itemsize = jnp.dtype(x.dtype).itemsize

    # Lane tile: never pad columns in HBM.  Small maps (e.g. 7x7 -> 49) keep
    # their native width (masked edge lanes are far cheaper than 2.6x traffic);
    # larger maps use 512-wide tiles with a ragged last column block.
    tc = cols if cols <= 512 else 512
    grid_n = pl.cdiv(cols, tc)

    if rows <= sub:
        tm = rows
    else:
        target_rows = max(1, (block_bytes // itemsize) // tc)
        tm = min((rows // sub) * sub, _round_up(target_rows, sub))
    grid_m = pl.cdiv(rows, tm)

    x2 = x.reshape(rows, cols)                      # contiguous view, no HBM pass

    # Per-channel alpha -> per-row scalar column in the (N*C, .) view (tiny array).
    w = prelu_weight.astype(x.dtype).reshape(-1)
    if w.shape[0] == 1:                             # nn.PReLU(1) style
        w = jnp.broadcast_to(w, (C,))
    alpha = jnp.broadcast_to(w[None, :], (N, C)).reshape(rows, 1)

    out2 = pl.pallas_call(
        _prelu_kernel,
        out_shape=jax.ShapeDtypeStruct((rows, cols), x.dtype),
        grid=(grid_m, grid_n),
        in_specs=[
            # alpha stays resident across the column axis (same block for all j)
            pl.BlockSpec((tm, 1), lambda i, j: (i, 0)),
            pl.BlockSpec((tm, tc), lambda i, j: (i, j)),
        ],
        out_specs=pl.BlockSpec((tm, tc), lambda i, j: (i, j)),
        input_output_aliases=({1: 0} if inplace else {}),
        compiler_params=pltpu.CompilerParams(
            dimension_semantics=_dim_semantics(2),
            vmem_limit_bytes=_VMEM_LIMIT),
    )(alpha, x2)
    return out2.reshape(N, C, H, W)


# ---------------------------------------------------------------------------
# Plain-JAX reference (also the tiny-tensor / ragged-total fallback)
# ---------------------------------------------------------------------------
def _jax_act(x, act_type, prelu_weight=None):
    if act_type == "relu":
        return jnp.maximum(x, 0.0)
    if act_type == "prelu":
        a = prelu_weight.astype(x.dtype).reshape(-1)
        if a.shape[0] == 1:
            a = jnp.broadcast_to(a, (x.shape[1],))
        a = a.reshape(1, -1, 1, 1)
        return jnp.where(x >= 0.0, x, a * x)
    if act_type == "hardswish":
        return x * jnp.clip(x + 3.0, 0.0, 6.0) / 6.0
    if act_type == "silu":
        return x * jax.nn.sigmoid(x)
    if act_type == "gelu":
        return 0.5 * x * (1.0 + jax.lax.erf(x / math.sqrt(2.0)))
    return x


# ---------------------------------------------------------------------------
# Wrapper (equivalent of Act.forward)
# ---------------------------------------------------------------------------
def act_forward(x, act_type="relu", prelu_weight=None, *,
                inplace=False, approximate_gelu=False,
                min_pallas_elems=_FALLBACK_ELEMS, block_bytes=_BLOCK_BYTES):
    """x: (N, C, H, W).  Returns activation(x) with identical shape/dtype.

    `inplace=True` adds input_output_aliases so the kernel writes into the
    input buffer; pair it with caller-side buffer donation to actually save
    the second HBM allocation.
    """
    if act_type not in _SUPPORTED:
        # Unknown act_type -> self.act is None -> identity
        return x

    # Small-tensor fallback: kernel launch + per-grid-step overhead dominate.
    if x.size < min_pallas_elems:
        return _jax_act(x, act_type, prelu_weight).astype(x.dtype)

    if act_type == "prelu":
        assert prelu_weight is not None
        return _prelu_pallas(x, prelu_weight, inplace=inplace,
                             block_bytes=block_bytes)
    return _elementwise_pallas(x, act_type, approximate_gelu=approximate_gelu,
                               inplace=inplace, block_bytes=block_bytes)


# ---------------------------------------------------------------------------
# Test
# ---------------------------------------------------------------------------
if __name__ == "__main__":
    key = jax.random.PRNGKey(0)
    N, C, H, W = 2, 4, 16, 16
    x = jax.random.normal(key, (N, C, H, W), dtype=jnp.float32)

    # PReLU parameter: PyTorch default init is a constant 0.25 per channel.
    prelu_w = jnp.full((C,), 0.25, dtype=jnp.float32)

    for act_type in ["relu", "prelu", "hardswish", "silu", "gelu", "none"]:
        w = prelu_w if act_type == "prelu" else None
        # Force the Pallas path (default dispatch would use the small-tensor
        # fallback at this test size).
        out = act_forward(x, act_type=act_type, prelu_weight=w,
                          min_pallas_elems=0)
        out = jax.block_until_ready(out)
        ref = _jax_act(x, act_type, prelu_weight=w)
        assert out.shape == x.shape and out.dtype == x.dtype, act_type
        assert jnp.allclose(out, ref, atol=1e-5, rtol=1e-5), f"mismatch: {act_type}"

    # Multi-step grid with a ragged last row-block (tiny block_bytes forces it).
    x_r = jax.random.normal(jax.random.PRNGKey(1), (2, 13, 16, 16), jnp.float32)
    out_r = jax.block_until_ready(
        act_forward(x_r, "relu", min_pallas_elems=0, block_bytes=4096))
    assert jnp.allclose(out_r, jnp.maximum(x_r, 0.0))

    # PReLU on a 7x7-style stage: cols = 49 (not a multiple of 128) + ragged rows.
    x_p = jax.random.normal(jax.random.PRNGKey(2), (2, 13, 7, 7), jnp.float32)
    w_p = jnp.linspace(0.05, 0.4, 13).astype(jnp.float32)
    out_p = jax.block_until_ready(
        act_forward(x_p, "prelu", prelu_weight=w_p,
                    min_pallas_elems=0, block_bytes=4096))
    assert jnp.allclose(out_p, _jax_act(x_p, "prelu", w_p), atol=1e-6)

    # bf16 path (packed sublane = 16).
    x_b = x.astype(jnp.bfloat16)
    out_b = jax.block_until_ready(act_forward(x_b, "silu", min_pallas_elems=0))
    assert out_b.dtype == jnp.bfloat16
    assert jnp.allclose(out_b.astype(jnp.float32),
                        _jax_act(x_b.astype(jnp.float32), "silu"),
                        atol=2e-2, rtol=2e-2)

    # In-place (input_output_aliases) path, exercised under jit.
    out_ip = jax.block_until_ready(
        jax.jit(lambda t: act_forward(t, "relu", min_pallas_elems=0,
                                      inplace=True))(x))
    assert jnp.allclose(out_ip, jnp.maximum(x, 0.0))

    # Default dispatch (small-tensor fallback path) also works.
    out_fb = jax.block_until_ready(act_forward(x, "relu"))
    assert jnp.allclose(out_fb, jnp.maximum(x, 0.0))

    print("KERNEL_OK")
</pallas_src>

<mosaic_0001>
module attributes {stable_mosaic.version = 11 : i64} {
  func.func @_act_kernel(%arg0: i32, %arg1: memref<1x2048xf32, #tpu.memory_space<vmem>>, %arg2: memref<1x2048xf32, #tpu.memory_space<vmem>>) attributes {dimension_semantics = [#tpu.dimension_semantics<parallel>], iteration_bounds = array<i64: 1>, scalar_prefetch = 0 : i64, scratch_operands = 0 : i64, tpu.core_type = #tpu.core_type<tc>, window_params = [{transform_indices = @transform_0, window_bounds = array<i64: 1, 2048>}, {transform_indices = @transform_1, window_bounds = array<i64: 1, 2048>}]} {
    %c0 = arith.constant 0 : index
    %c0_0 = arith.constant 0 : index
    %0 = vector.load %arg1[%c0, %c0_0] : memref<1x2048xf32, #tpu.memory_space<vmem>>, vector<1x2048xf32>
    %cst = arith.constant 0.000000e+00 : f32
    %1 = vector.broadcast %cst : f32 to vector<1x2048xf32>
    %2 = arith.maximumf %0, %1 : vector<1x2048xf32>
    %c0_1 = arith.constant 0 : index
    %c0_2 = arith.constant 0 : index
    %3 = vector.load %arg2[%c0_1, %c0_2] : memref<1x2048xf32, #tpu.memory_space<vmem>>, vector<1x2048xf32>
    tpu.vector_store %arg2[%c0_1, %c0_2], %2 {strides = array<i32>} : memref<1x2048xf32, #tpu.memory_space<vmem>>, vector<1x2048xf32>,
    return
  }
  func.func @transform_0(%arg0: i32) -> (i32, i32) {
    %c0_i32 = arith.constant 0 : i32
    %c0_i32_0 = arith.constant 0 : i32
    return %arg0, %c0_i32 : i32, i32
  }
  func.func @transform_1(%arg0: i32) -> (i32, i32) {
    %c0_i32 = arith.constant 0 : i32
    %c0_i32_0 = arith.constant 0 : i32
    return %arg0, %c0_i32 : i32, i32
  }
}

</mosaic_0001>

<bundles_post_ra>
// kernel: tpu_custom_call.1
= control target key start
LH: loop header
LB: loop body
LE: loop exit
PB: predicated region body
PF: predicated region fallthrough
CT: control target
= control target key end

     0   :  { %6 = vsyncpa [#allocation3], 0  ;;  %s106_s0 = inlined_call_operand.hbm [shape: f32[1,2048], index: 0, kind: input, shape index: {}]   ;;  %s107_s1 = inlined_call_operand.hbm [shape: f32[1,2048], index: 1, kind: output, shape index: {}]  }
   0x1   :  { %7 = vsyncpa [#allocation4], 0  ;;  %s88_s6 = smov [#allocation2]  }
   0x2   :  { %s14_s7 = sshll.u32 %s88_s6, 4  ;;  %s15_s7 = int_to_ptr.vmem [resolvable:$true] %s14_s7 }
   0x3   :  { %s52_s8 = scalar_lea.vmem %s15_s7, 256  ;;  %p57_p1 = scmp.lt.s32.totalorder %s15_s7, %s15_s7 }
   0x4   :  { %p53_p0 = scmp.ne.s32.totalorder %s15_s7, %s52_s8  ;;  %p58_p2 = scmp.lt.s32.totalorder %s52_s8, %s52_s8 }
   0x6   :  { %p59_p3 = por %p58_p2, %p57_p1 }
   0x8   :  { %p60_p4 = pnand %p59_p3, %p53_p0 }
   0xa   :  { %63 = shalt.err (!%p60_p4)
}
   0xb   :  { %17 = dma.hbm_to_vmem [thread:$0]  %s106_s0, 256, %s15_s7, [#allocation3]  }
   0xc   :  { %84 = dma.done.wait [#allocation3], 256  }
   0xd   :  { %85 = vsyncadd [#allocation3], 4294967040  ;;  %s89_s11 = smov [#allocation5]   ;;  %v21_v0 = vld [vmem:[#allocation2] sm:$0xff]  ;;  %v22_v1 = vld [vmem:[#allocation2 + $0x8] sm:$0xff] }
   0xe   :  { %s33_s12 = sshll.u32 %s89_s11, 4  ;;  %v23_v2 = vmax.f32 %v21_v0, 0.0  ;;  %v24_v3 = vmax.f32 %v22_v1, 0.0  ;;  %s34_s12 = int_to_ptr.vmem [resolvable:$true] %s33_s12 }
   0xf   :  { %s64_s13 = scalar_lea.vmem %s34_s12, 256  ;;  %p69_p6 = scmp.lt.s32.totalorder %s34_s12, %s34_s12 }
  0x10   :  { %25 = vst [vmem:[#allocation5] sm:$0xff] %v23_v2  ;;  %26 = vst [vmem:[#allocation5 + $0x8] sm:$0xff] %v24_v3  ;;  %p65_p5 = scmp.ne.s32.totalorder %s34_s12, %s64_s13  ;;  %p70_p7 = scmp.lt.s32.totalorder %s64_s13, %s64_s13 }
  0x12   :  { %p71_p8 = por %p70_p7, %p69_p6 }
  0x14   :  { %p72_p9 = pnand %p71_p8, %p65_p5 }
  0x16   :  { %75 = shalt.err (!%p72_p9)
}
  0x17   :  { %36 = dma.vmem_to_hbm [thread:$0]  %s34_s12, 256, %s107_s1, [#allocation4]  }
  0x18   :  { %86 = dma.done.wait [#allocation4], 256  }
  0x19   :  { %87 = vsyncadd [#allocation4], 4294967040 }
  0x1a   :  { %40 = vsyncpa [#allocation3], 1 }
  0x1b   :  { %41 = vsyncpa [#allocation4], 1 }

</bundles_post_ra>
